<compile_context>
chip_gen: v7x
topology: tpu7x:2x2x1
jax: 0.10.0
libtpu: 0.0.40
codegen_flags: <defaults>
</compile_context>

<pallas_src>
import functools

import jax
import jax.numpy as jnp
from jax.experimental import pallas as pl
from jax.experimental.pallas import tpu as pltpu

LANE = 128


def _round_up(n, m):
    return (n + m - 1) // m * m


def txtnet_kernel(x_ref, w1_ref, b1_ref, w3_ref, b3_ref, out_ref, *, code_len):
    # Cast x on the VPU (x arrives as f32 from HBM; no separate wrapper pass).
    x16 = x_ref[...].astype(jnp.bfloat16)

    # hidden = relu(x @ W1 + b1)   (bf16 operands, f32 accumulation on the MXU)
    h = jnp.dot(x16, w1_ref[...], preferred_element_type=jnp.float32)
    h = jnp.maximum(h + b1_ref[...], 0.0)

    # TODO(synk): nn.Dropout(0.3) is identity in eval mode; training-mode stochastic
    # masking (pltpu.prng_seed + pltpu.stateful_bernoulli) is intentionally omitted.

    # y = h @ W3_packed + b3_packed : lanes [0:code_len] and [code_len:2*code_len]
    # both hold feat (duplicated weight columns); remaining lanes are exactly 0.
    y = jnp.dot(h.astype(jnp.bfloat16), w3_ref[...],
                preferred_element_type=jnp.float32) + b3_ref[...]

    # Packed output: feat in lanes [0:code_len], code = tanh(10*feat) in lanes
    # [code_len:2*code_len] (tanh(0)=0 keeps padding lanes zero). Single
    # lane-dense unmasked store.
    lane = jax.lax.broadcasted_iota(jnp.int32, y.shape, 1)
    out_ref[...] = jnp.where(lane < code_len, y, jnp.tanh(10.0 * y)).astype(out_ref.dtype)


def prepare_params(w1, b1, w3, b3):
    """One-time parameter preparation (bf16 cast + lane packing). Do NOT call per step."""
    code_len = w3.shape[1]
    H = w3.shape[0]
    P = _round_up(2 * code_len, LANE)

    w3p = jnp.zeros((H, P), jnp.float32)
    w3p = w3p.at[:, :code_len].set(w3).at[:, code_len:2 * code_len].set(w3)
    b3p = jnp.zeros((1, P), jnp.float32)
    b3p = b3p.at[:, :code_len].set(b3).at[:, code_len:2 * code_len].set(b3)

    return {
        "w1": w1.astype(jnp.bfloat16),
        "b1": b1.astype(jnp.float32),
        "w3p": w3p.astype(jnp.bfloat16),
        "b3p": b3p.astype(jnp.float32),
        "code_len": int(code_len),
    }


def txtnet_forward(x, params, *, batch_tile=128):
    w1, b1 = params["w1"], params["b1"]
    w3p, b3p = params["w3p"], params["b3p"]
    code_len = params["code_len"]

    B, F = x.shape
    H = w1.shape[1]
    P = w3p.shape[1]

    # cdiv grid over the batch: tile of 128 keeps both v7x TensorCores busy for
    # B >= 256; small B is rounded up to a multiple of 8 (sublane constraint).
    tm = batch_tile if B >= batch_tile else _round_up(B, 8)
    B_pad = _round_up(B, tm)
    if B_pad != B:
        x = jnp.pad(x, ((0, B_pad - B), (0, 0)))
    grid = (B_pad // tm,)

    cost = pl.CostEstimate(
        flops=2 * B_pad * (F * H + H * P),
        transcendentals=B_pad * P,
        bytes_accessed=(B_pad * F * 4            # x (f32 in, cast in-kernel)
                        + F * H * 2 + H * 4      # w1 (bf16) + b1 (f32)
                        + H * P * 2 + P * 4      # w3p (bf16) + b3p (f32)
                        + B_pad * P * 4),        # packed output (f32)
    )

    packed = pl.pallas_call(
        functools.partial(txtnet_kernel, code_len=code_len),
        out_shape=jax.ShapeDtypeStruct((B_pad, P), jnp.float32),
        grid=grid,
        in_specs=[
            pl.BlockSpec((tm, F), lambda i: (i, 0)),   # x tile over batch
            pl.BlockSpec((F, H), lambda i: (0, 0)),    # w1 resident
            pl.BlockSpec((1, H), lambda i: (0, 0)),    # b1 resident
            pl.BlockSpec((H, P), lambda i: (0, 0)),    # w3 (packed) resident
            pl.BlockSpec((1, P), lambda i: (0, 0)),    # b3 (packed) resident
        ],
        out_specs=pl.BlockSpec((tm, P), lambda i: (i, 0)),
        compiler_params=pltpu.CompilerParams(
            dimension_semantics=("parallel",),
        ),
        cost_estimate=cost,
    )(x, w1, b1, w3p, b3p)

    feat = packed[:B, :code_len]
    code = packed[:B, code_len:2 * code_len]
    # PyTorch forward returns (feat, feat, code)
    return feat, feat, code


def init_params(key, txt_feat_len, code_len, hidden=2048):
    k1, k2, k3, k4 = jax.random.split(key, 4)
    # fc1: PyTorch default init ~ U(-1/sqrt(fan_in), 1/sqrt(fan_in))
    bound1 = 1.0 / jnp.sqrt(jnp.float32(txt_feat_len))
    w1 = jax.random.uniform(k1, (txt_feat_len, hidden), jnp.float32, -bound1, bound1)
    b1 = jax.random.uniform(k2, (1, hidden), jnp.float32, -bound1, bound1)
    # fc3: weight ~ N(0, 1) per torch.nn.init.normal_(std=1); bias default uniform
    w3 = jax.random.normal(k3, (hidden, code_len), jnp.float32)
    bound3 = 1.0 / jnp.sqrt(jnp.float32(hidden))
    b3 = jax.random.uniform(k4, (1, code_len), jnp.float32, -bound3, bound3)
    return w1, b1, w3, b3


if __name__ == "__main__":
    # Small, module-consistent shapes: batch=8, txt_feat_len=128, code_len=32, hidden=2048.
    B, TXT_FEAT_LEN, CODE_LEN, HIDDEN = 8, 128, 32, 2048

    key = jax.random.PRNGKey(0)
    kx, kp = jax.random.split(key)
    x = jax.random.normal(kx, (B, TXT_FEAT_LEN), jnp.float32)
    w1, b1, w3, b3 = init_params(kp, TXT_FEAT_LEN, CODE_LEN, HIDDEN)

    params = prepare_params(w1, b1, w3, b3)          # one-time, outside the call path
    fwd = jax.jit(lambda xx: txtnet_forward(xx, params))

    feat, feat2, code = fwd(x)
    jax.block_until_ready((feat, feat2, code))

    # Reference in plain JAX with the same bf16-operand / f32-accumulate numerics.
    h_ref = jnp.maximum(
        jnp.dot(x.astype(jnp.bfloat16), w1.astype(jnp.bfloat16),
                preferred_element_type=jnp.float32) + b1,
        0.0,
    )
    feat_ref = jnp.dot(h_ref.astype(jnp.bfloat16), w3.astype(jnp.bfloat16),
                       preferred_element_type=jnp.float32) + b3
    code_ref = jnp.tanh(10.0 * feat_ref)

    assert feat.shape == (B, CODE_LEN) and code.shape == (B, CODE_LEN)
    assert jnp.allclose(feat, feat_ref, atol=1e-2, rtol=1e-2)
    assert jnp.allclose(feat2, feat_ref, atol=1e-2, rtol=1e-2)
    assert jnp.allclose(code, code_ref, atol=2e-2, rtol=2e-2)

    print("KERNEL_OK")
</pallas_src>

<mosaic_0001>
module attributes {stable_mosaic.version = 11 : i64} {
  func.func @txtnet_kernel(%arg0: i32, %arg1: memref<8x128xf32, #tpu.memory_space<vmem>>, %arg2: memref<128x2048xbf16, #tpu.memory_space<vmem>>, %arg3: memref<1x2048xf32, #tpu.memory_space<vmem>>, %arg4: memref<2048x128xbf16, #tpu.memory_space<vmem>>, %arg5: memref<1x128xf32, #tpu.memory_space<vmem>>, %arg6: memref<8x128xf32, #tpu.memory_space<vmem>>) attributes {dimension_semantics = [#tpu.dimension_semantics<parallel>], iteration_bounds = array<i64: 1>, scalar_prefetch = 0 : i64, scratch_operands = 0 : i64, tpu.core_type = #tpu.core_type<tc>, window_params = [{transform_indices = @transform_0, window_bounds = array<i64: 8, 128>}, {pipeline_mode = #tpu.pipeline_mode<synchronous>, transform_indices = @transform_1, window_bounds = array<i64: 128, 2048>}, {pipeline_mode = #tpu.pipeline_mode<synchronous>, transform_indices = @transform_2, window_bounds = array<i64: 1, 2048>}, {pipeline_mode = #tpu.pipeline_mode<synchronous>, transform_indices = @transform_3, window_bounds = array<i64: 2048, 128>}, {pipeline_mode = #tpu.pipeline_mode<synchronous>, transform_indices = @transform_4, window_bounds = array<i64: 1, 128>}, {transform_indices = @transform_5, window_bounds = array<i64: 8, 128>}]} {
    %c0 = arith.constant 0 : index
    %c0_0 = arith.constant 0 : index
    %0 = vector.load %arg1[%c0, %c0_0] : memref<8x128xf32, #tpu.memory_space<vmem>>, vector<8x128xf32>
    %1 = arith.truncf %0 : vector<8x128xf32> to vector<8x128xbf16>
    %c0_1 = arith.constant 0 : index
    %c0_2 = arith.constant 0 : index
    %2 = vector.load %arg2[%c0_1, %c0_2] : memref<128x2048xbf16, #tpu.memory_space<vmem>>, vector<128x2048xbf16>
    %cst = arith.constant dense<0.000000e+00> : vector<8x2048xf32>
    %3 = tpu.matmul %1, %2, %cst {dimension_numbers = #tpu.dot_dimension_numbers<[1], [0], [0], [1], [0, 0, 1, 1], [], []>} : vector<8x128xbf16>, vector<128x2048xbf16>, vector<8x2048xf32> -> vector<8x2048xf32>
    %c0_3 = arith.constant 0 : index
    %c0_4 = arith.constant 0 : index
    %4 = vector.load %arg3[%c0_3, %c0_4] : memref<1x2048xf32, #tpu.memory_space<vmem>>, vector<1x2048xf32>
    %5 = vector.broadcast %4 : vector<1x2048xf32> to vector<8x2048xf32>
    %6 = arith.addf %3, %5 : vector<8x2048xf32>
    %cst_5 = arith.constant 0.000000e+00 : f32
    %7 = vector.broadcast %cst_5 : f32 to vector<8x2048xf32>
    %8 = arith.maximumf %6, %7 : vector<8x2048xf32>
    %9 = arith.truncf %8 : vector<8x2048xf32> to vector<8x2048xbf16>
    %c0_6 = arith.constant 0 : index
    %c0_7 = arith.constant 0 : index
    %10 = vector.load %arg4[%c0_6, %c0_7] : memref<2048x128xbf16, #tpu.memory_space<vmem>>, vector<2048x128xbf16>
    %cst_8 = arith.constant dense<0.000000e+00> : vector<8x128xf32>
    %11 = tpu.matmul %9, %10, %cst_8 {dimension_numbers = #tpu.dot_dimension_numbers<[1], [0], [0], [1], [0, 0, 1, 1], [], []>} : vector<8x2048xbf16>, vector<2048x128xbf16>, vector<8x128xf32> -> vector<8x128xf32>
    %c0_9 = arith.constant 0 : index
    %c0_10 = arith.constant 0 : index
    %12 = vector.load %arg5[%c0_9, %c0_10] : memref<1x128xf32, #tpu.memory_space<vmem>>, vector<1x128xf32>
    %13 = vector.broadcast %12 : vector<1x128xf32> to vector<8x128xf32>
    %14 = arith.addf %11, %13 : vector<8x128xf32>
    %15 = tpu.iota {dimensions = array<i32: 1>} : vector<8x128xi32>
    %c32_i32 = arith.constant 32 : i32
    %16 = vector.broadcast %c32_i32 : i32 to vector<8x128xi32>
    %17 = arith.cmpi slt, %15, %16 : vector<8x128xi32>
    %cst_11 = arith.constant 1.000000e+01 : f32
    %18 = vector.broadcast %cst_11 : f32 to vector<8x128xf32>
    %19 = arith.mulf %18, %14 : vector<8x128xf32>
    %20 = math.tanh %19 : vector<8x128xf32>
    %21 = arith.select %17, %14, %20 : vector<8x128xi1>, vector<8x128xf32>
    %c0_12 = arith.constant 0 : index
    %c0_13 = arith.constant 0 : index
    %22 = vector.load %arg6[%c0_12, %c0_13] : memref<8x128xf32, #tpu.memory_space<vmem>>, vector<8x128xf32>
    tpu.vector_store %arg6[%c0_12, %c0_13], %21 {strides = array<i32>} : memref<8x128xf32, #tpu.memory_space<vmem>>, vector<8x128xf32>,
    return
  }
  func.func @transform_0(%arg0: i32) -> (i32, i32) {
    %c0_i32 = arith.constant 0 : i32
    %c0_i32_0 = arith.constant 0 : i32
    return %arg0, %c0_i32 : i32, i32
  }
  func.func @transform_1(%arg0: i32) -> (i32, i32) {
    %c0_i32 = arith.constant 0 : i32
    %c0_i32_0 = arith.constant 0 : i32
    %c0_i32_1 = arith.constant 0 : i32
    return %c0_i32, %c0_i32_0 : i32, i32
  }
  func.func @transform_2(%arg0: i32) -> (i32, i32) {
    %c0_i32 = arith.constant 0 : i32
    %c0_i32_0 = arith.constant 0 : i32
    %c0_i32_1 = arith.constant 0 : i32
    return %c0_i32, %c0_i32_0 : i32, i32
  }
  func.func @transform_3(%arg0: i32) -> (i32, i32) {
    %c0_i32 = arith.constant 0 : i32
    %c0_i32_0 = arith.constant 0 : i32
    %c0_i32_1 = arith.constant 0 : i32
    return %c0_i32, %c0_i32_0 : i32, i32
  }
  func.func @transform_4(%arg0: i32) -> (i32, i32) {
    %c0_i32 = arith.constant 0 : i32
    %c0_i32_0 = arith.constant 0 : i32
    %c0_i32_1 = arith.constant 0 : i32
    return %c0_i32, %c0_i32_0 : i32, i32
  }
  func.func @transform_5(%arg0: i32) -> (i32, i32) {
    %c0_i32 = arith.constant 0 : i32
    %c0_i32_0 = arith.constant 0 : i32
    return %arg0, %c0_i32 : i32, i32
  }
}

</mosaic_0001>

<bundles_post_ra>
// kernel: _lambda_.1
= control target key start
LH: loop header
LB: loop body
LE: loop exit
PB: predicated region body
PF: predicated region fallthrough
CT: control target
= control target key end

     0   :  { %v3161_v3 = vmov 0   ;;  %s4055_s1 = inlined_call_operand.vmem [shape: bf16[128,2048], index: 1, kind: input, shape index: {}]   ;;  %s4056_s0 = inlined_call_operand.vmem [shape: f32[8,128], index: 0, kind: input, shape index: {}]   ;;  %s4057_s3 = inlined_call_operand.vmem [shape: bf16[2048,128], index: 3, kind: input, shape index: {}]   ;;  %s4058_s2 = inlined_call_operand.vmem [shape: f32[1,2048], index: 2, kind: input, shape index: {}]   ;;  %s4059_s4 = inlined_call_operand.vmem [shape: f32[1,128], index: 4, kind: input, shape index: {}]   ;;  %s4060_s5 = inlined_call_operand.vmem [shape: f32[8,128], index: 5, kind: output, shape index: {}]  }
   0x1   :  { %v23_v0 = vld [vmem:[%s4055_s1] sm:$0xff]  ;;  %v24_v2 = vld [vmem:[%s4055_s1 + $0x8] sm:$0xff]  ;;  %907 = vmatprep.mubr.bf16.mxu0 %v3161_v3  ;;  %948 = vmatprep.mubr.bf16.mxu1 %v3161_v3  ;;  %v25_v63 = vld [vmem:[%s4055_s1 + $0x10] sm:$0xff] }
   0x2   :  { %v31_v1 = vld [vmem:[%s4055_s1 + $0x40] sm:$0xff]  ;;  %v32_v5 = vld [vmem:[%s4055_s1 + $0x48] sm:$0xff] }
   0x3   :  { %v2598_v4 = vcombine.high %v23_v0, %v31_v1  ;;  %v2597_v6 = vcombine.low %v23_v0, %v31_v1  ;;  %v39_v7 = vld [vmem:[%s4055_s1 + $0x80] sm:$0xff]  ;;  %v2600_v9 = vcombine.high %v24_v2, %v32_v5  ;;  %v2599_v10 = vcombine.low %v24_v2, %v32_v5  ;;  %v40_v12 = vld [vmem:[%s4055_s1 + $0x88] sm:$0xff]  ;;  %v33_v0 = vld [vmem:[%s4055_s1 + $0x50] sm:$0xff] }
   0x4   :  { %v47_v8 = vld [vmem:[%s4055_s1 + $0xc0] sm:$0xff]  ;;  %v48_v13 = vld [vmem:[%s4055_s1 + $0xc8] sm:$0xff]  ;;  %v26_v1 = vld [vmem:[%s4055_s1 + $0x18] sm:$0xff] }
   0x5   :  { %v2614_v11 = vcombine.high %v39_v7, %v47_v8  ;;  %v55_v14 = vld [vmem:[%s4055_s1 + $0x100] sm:$0xff]  ;;  %875 = vmatprep.subr.bf16.mxu0 %v2598_v4  ;;  %v2616_v15 = vcombine.high %v40_v12, %v48_v13  ;;  %v56_v17 = vld [vmem:[%s4055_s1 + $0x108] sm:$0xff]  ;;  %916 = vmatprep.subr.bf16.mxu1 %v2600_v9  ;;  %v2613_v19 = vcombine.low %v39_v7, %v47_v8  ;;  %v34_v2 = vld [vmem:[%s4055_s1 + $0x58] sm:$0xff] }
   0x6   :  { %v63_v16 = vld [vmem:[%s4055_s1 + $0x140] sm:$0xff]  ;;  %v64_v18 = vld [vmem:[%s4055_s1 + $0x148] sm:$0xff]  ;;  %876 = vmatpush1.bf16.msra.mxu0 %v2597_v6  ;;  %917 = vmatpush1.bf16.msra.mxu1 %v2599_v10  ;;  %v2615_v20 = vcombine.low %v40_v12, %v48_v13  ;;  %v2602_v7 = vcombine.high %v25_v63, %v33_v0  ;;  %v2604_v8 = vcombine.high %v26_v1, %v34_v2  ;;  %v41_v9 = vld [vmem:[%s4055_s1 + $0x90] sm:$0xff] }
   0x7   :  { %877 = vmatprep.subr.bf16.mxu0 %v2614_v11  ;;  %v2630_v21 = vcombine.high %v55_v14, %v63_v16  ;;  %918 = vmatprep.subr.bf16.mxu1 %v2616_v15  ;;  %v2632_v22 = vcombine.high %v56_v17, %v64_v18  ;;  %v71_v23 = vld [vmem:[%s4055_s1 + $0x180] sm:$0xff]  ;;  %v72_v25 = vld [vmem:[%s4055_s1 + $0x188] sm:$0xff]  ;;  %v2629_v27 = vcombine.low %v55_v14, %v63_v16  ;;  %v49_v10 = vld [vmem:[%s4055_s1 + $0xd0] sm:$0xff] }
   0x8   :  { %v79_v24 = vld [vmem:[%s4055_s1 + $0x1c0] sm:$0xff]  ;;  %v80_v26 = vld [vmem:[%s4055_s1 + $0x1c8] sm:$0xff]  ;;  %v2631_v28 = vcombine.low %v56_v17, %v64_v18  ;;  %v42_v12 = vld [vmem:[%s4055_s1 + $0x98] sm:$0xff]  ;;  %v2601_v14 = vcombine.low %v25_v63, %v33_v0  ;;  %v2603_v15 = vcombine.low %v26_v1, %v34_v2  ;;  %v2618_v16 = vcombine.high %v41_v9, %v49_v10 }
   0x9   :  { %v2646_v29 = vcombine.high %v71_v23, %v79_v24  ;;  %v2648_v30 = vcombine.high %v72_v25, %v80_v26  ;;  %v87_v31 = vld [vmem:[%s4055_s1 + $0x200] sm:$0xff]  ;;  %v88_v33 = vld [vmem:[%s4055_s1 + $0x208] sm:$0xff]  ;;  %v2645_v35 = vcombine.low %v71_v23, %v79_v24  ;;  %v2647_v36 = vcombine.low %v72_v25, %v80_v26  ;;  %v50_v13 = vld [vmem:[%s4055_s1 + $0xd8] sm:$0xff] }
   0xa   :  { %878 = vmatpush1.bf16.msra.mxu0 %v2613_v19  ;;  %919 = vmatpush1.bf16.msra.mxu1 %v2615_v20  ;;  %v95_v32 = vld [vmem:[%s4055_s1 + $0x240] sm:$0xff]  ;;  %v96_v34 = vld [vmem:[%s4055_s1 + $0x248] sm:$0xff]  ;;  %v2620_v17 = vcombine.high %v42_v12, %v50_v13  ;;  %v57_v18 = vld [vmem:[%s4055_s1 + $0x110] sm:$0xff]  ;;  %v2619_v23 = vcombine.low %v42_v12, %v50_v13 }
   0xb   :  { %879 = vmatprep.subr.bf16.mxu0 %v2630_v21  ;;  %920 = vmatprep.subr.bf16.mxu1 %v2632_v22  ;;  %v2662_v37 = vcombine.high %v87_v31, %v95_v32  ;;  %v2664_v38 = vcombine.high %v88_v33, %v96_v34  ;;  %v103_v39 = vld [vmem:[%s4055_s1 + $0x280] sm:$0xff]  ;;  %v104_v41 = vld [vmem:[%s4055_s1 + $0x288] sm:$0xff]  ;;  %v2661_v43 = vcombine.low %v87_v31, %v95_v32  ;;  %v65_v19 = vld [vmem:[%s4055_s1 + $0x150] sm:$0xff] }
   0xc   :  { %v111_v40 = vld [vmem:[%s4055_s1 + $0x2c0] sm:$0xff]  ;;  %v112_v42 = vld [vmem:[%s4055_s1 + $0x2c8] sm:$0xff]  ;;  %v2663_v44 = vcombine.low %v88_v33, %v96_v34  ;;  %v58_v20 = vld [vmem:[%s4055_s1 + $0x118] sm:$0xff]  ;;  %v2617_v22 = vcombine.low %v41_v9, %v49_v10  ;;  %v2634_v24 = vcombine.high %v57_v18, %v65_v19 }
   0xd   :  { %v2678_v45 = vcombine.high %v103_v39, %v111_v40  ;;  %v2680_v46 = vcombine.high %v104_v41, %v112_v42  ;;  %v119_v47 = vld [vmem:[%s4055_s1 + $0x300] sm:$0xff]  ;;  %v120_v49 = vld [vmem:[%s4055_s1 + $0x308] sm:$0xff]  ;;  %v2677_v51 = vcombine.low %v103_v39, %v111_v40  ;;  %v2679_v52 = vcombine.low %v104_v41, %v112_v42  ;;  %v66_v21 = vld [vmem:[%s4055_s1 + $0x158] sm:$0xff] }
   0xe   :  { %880 = vmatpush1.bf16.msra.mxu0 %v2629_v27  ;;  %921 = vmatpush1.bf16.msra.mxu1 %v2631_v28  ;;  %v127_v48 = vld [vmem:[%s4055_s1 + $0x340] sm:$0xff]  ;;  %v128_v50 = vld [vmem:[%s4055_s1 + $0x348] sm:$0xff]  ;;  %v2636_v25 = vcombine.high %v58_v20, %v66_v21  ;;  %v73_v26 = vld [vmem:[%s4055_s1 + $0x190] sm:$0xff]  ;;  %v2635_v31 = vcombine.low %v58_v20, %v66_v21 }
   0xf   :  { %881 = vmatprep.subr.bf16.mxu0 %v2646_v29  ;;  %922 = vmatprep.subr.bf16.mxu1 %v2648_v30  ;;  %v2694_v53 = vcombine.high %v119_v47, %v127_v48  ;;  %v2696_v54 = vcombine.high %v120_v49, %v128_v50  ;;  %v135_v55 = vld [vmem:[%s4055_s1 + $0x380] sm:$0xff]  ;;  %v136_v57 = vld [vmem:[%s4055_s1 + $0x388] sm:$0xff]  ;;  %v2693_v59 = vcombine.low %v119_v47, %v127_v48  ;;  %v81_v27 = vld [vmem:[%s4055_s1 + $0x1d0] sm:$0xff] }
  0x10   :  { %v143_v56 = vld [vmem:[%s4055_s1 + $0x3c0] sm:$0xff]  ;;  %v144_v58 = vld [vmem:[%s4055_s1 + $0x3c8] sm:$0xff]  ;;  %v2695_v60 = vcombine.low %v120_v49, %v128_v50  ;;  %v74_v28 = vld [vmem:[%s4055_s1 + $0x198] sm:$0xff]  ;;  %v2633_v30 = vcombine.low %v57_v18, %v65_v19  ;;  %v2650_v32 = vcombine.high %v73_v26, %v81_v27 }
  0x11   :  { %v2710_v61 = vcombine.high %v135_v55, %v143_v56  ;;  %v2712_v62 = vcombine.high %v136_v57, %v144_v58  ;;  %v2709_v4 = vcombine.low %v135_v55, %v143_v56  ;;  %v21_v5 = vld [vmem:[%s4056_s0] sm:$0xff]  ;;  %v2711_v6 = vcombine.low %v136_v57, %v144_v58  ;;  %v82_v29 = vld [vmem:[%s4055_s1 + $0x1d8] sm:$0xff]  ;;  %v89_v34 = vld [vmem:[%s4055_s1 + $0x210] sm:$0xff] }
  0x12   :  { %882 = vmatpush1.bf16.msra.mxu0 %v2645_v35  ;;  %923 = vmatpush1.bf16.msra.mxu1 %v2647_v36  ;;  %v3311_v11 = vpack.c.bf16 %v21_v5, %v21_v5  ;;  %v2652_v33 = vcombine.high %v74_v28, %v82_v29  ;;  %v97_v35 = vld [vmem:[%s4055_s1 + $0x250] sm:$0xff]  ;;  %v90_v36 = vld [vmem:[%s4055_s1 + $0x218] sm:$0xff]  ;;  %v2651_v40 = vcombine.low %v74_v28, %v82_v29  ;;  %v27_v63 = vld [vmem:[%s4055_s1 + $0x20] sm:$0xff] }
  0x13   :  { %883 = vmatprep.subr.bf16.mxu0 %v2662_v37  ;;  %924 = vmatprep.subr.bf16.mxu1 %v2664_v38  ;;  %v98_v37 = vld [vmem:[%s4055_s1 + $0x258] sm:$0xff]  ;;  %v2649_v38 = vcombine.low %v73_v26, %v81_v27  ;;  %v105_v39 = vld [vmem:[%s4055_s1 + $0x290] sm:$0xff]  ;;  %v2666_v41 = vcombine.high %v89_v34, %v97_v35  ;;  %v35_v2 = vld [vmem:[%s4055_s1 + $0x60] sm:$0xff] }
  0x14   :  { %v113_v42 = vld [vmem:[%s4055_s1 + $0x2d0] sm:$0xff]  ;;  %v2667_v48 = vcombine.low %v90_v36, %v98_v37  ;;  %v28_v5 = vld [vmem:[%s4055_s1 + $0x28] sm:$0xff]  ;;  %v2606_v10 = vcombine.high %v27_v63, %v35_v2  ;;  %v51_v12 = vld [vmem:[%s4055_s1 + $0xe0] sm:$0xff] }
  0x15   :  { %v121_v47 = vld [vmem:[%s4055_s1 + $0x310] sm:$0xff]  ;;  %v2682_v49 = vcombine.high %v105_v39, %v113_v42  ;;  %v67_v20 = vld [vmem:[%s4055_s1 + $0x160] sm:$0xff]  ;;  %v76_v29 = vld [vmem:[%s4055_s1 + $0x1a8] sm:$0xff] }
  0x16   :  { %884 = vmatpush1.bf16.msra.mxu0 %v2661_v43  ;;  %925 = vmatpush1.bf16.msra.mxu1 %v2663_v44  ;;  %v2668_v43 = vcombine.high %v90_v36, %v98_v37  ;;  %v106_v44 = vld [vmem:[%s4055_s1 + $0x298] sm:$0xff]  ;;  %v129_v50 = vld [vmem:[%s4055_s1 + $0x350] sm:$0xff]  ;;  %v83_v26 = vld [vmem:[%s4055_s1 + $0x1e0] sm:$0xff] }
  0x17   :  { %885 = vmatprep.subr.bf16.mxu0 %v2678_v45  ;;  %926 = vmatprep.subr.bf16.mxu1 %v2680_v46  ;;  %v114_v45 = vld [vmem:[%s4055_s1 + $0x2d8] sm:$0xff]  ;;  %v2665_v46 = vcombine.low %v89_v34, %v97_v35  ;;  %v137_v55 = vld [vmem:[%s4055_s1 + $0x390] sm:$0xff]  ;;  %v2698_v57 = vcombine.high %v121_v47, %v129_v50  ;;  %v99_v34 = vld [vmem:[%s4055_s1 + $0x260] sm:$0xff] }
  0x18   :  { %v2683_v56 = vcombine.low %v106_v44, %v114_v45  ;;  %v145_v58 = vld [vmem:[%s4055_s1 + $0x3d0] sm:$0xff]  ;;  %v92_v37 = vld [vmem:[%s4055_s1 + $0x228] sm:$0xff] }
  0x19   :  { %v2714_v1 = vcombine.high %v137_v55, %v145_v58 }
  0x1a   :  { %886 = vmatpush1.bf16.msra.mxu0 %v2677_v51  ;;  %927 = vmatpush1.bf16.msra.mxu1 %v2679_v52  ;;  %v2684_v51 = vcombine.high %v106_v44, %v114_v45  ;;  %v122_v52 = vld [vmem:[%s4055_s1 + $0x318] sm:$0xff]  ;;  %v108_v45 = vld [vmem:[%s4055_s1 + $0x2a8] sm:$0xff] }
  0x1b   :  { %887 = vmatprep.subr.bf16.mxu0 %v2694_v53  ;;  %928 = vmatprep.subr.bf16.mxu1 %v2696_v54  ;;  %v130_v53 = vld [vmem:[%s4055_s1 + $0x358] sm:$0xff]  ;;  %v2681_v54 = vcombine.low %v105_v39, %v113_v42  ;;  %v115_v42 = vld [vmem:[%s4055_s1 + $0x2e0] sm:$0xff] }
  0x1c   :  { %v2699_v0 = vcombine.low %v122_v52, %v130_v53 }
  0x1e   :  { %888 = vmatpush1.bf16.msra.mxu0 %v2693_v59  ;;  %929 = vmatpush1.bf16.msra.mxu1 %v2695_v60  ;;  %v2700_v59 = vcombine.high %v122_v52, %v130_v53  ;;  %v138_v60 = vld [vmem:[%s4055_s1 + $0x398] sm:$0xff]  ;;  %v124_v53 = vld [vmem:[%s4055_s1 + $0x328] sm:$0xff] }
  0x1f   :  { %889 = vmatprep.subr.bf16.mxu0 %v2710_v61  ;;  %930 = vmatprep.subr.bf16.mxu1 %v2712_v62  ;;  %v146_v61 = vld [vmem:[%s4055_s1 + $0x3d8] sm:$0xff]  ;;  %v2697_v62 = vcombine.low %v121_v47, %v129_v50  ;;  %v131_v50 = vld [vmem:[%s4055_s1 + $0x360] sm:$0xff] }
  0x20   :  { %v2715_v9 = vcombine.low %v138_v60, %v146_v61 }
  0x22   :  { %890 = vmatpush1.bf16.msra.mxu0 %v2709_v4  ;;  %931 = vmatpush1.bf16.msra.mxu1 %v2711_v6  ;;  %v2716_v4 = vcombine.high %v138_v60, %v146_v61  ;;  %v36_v6 = vld [vmem:[%s4055_s1 + $0x68] sm:$0xff] }
  0x23   :  { %957 = vmatprep.subr.bf16.mxu0 %v2602_v7  ;;  %998 = vmatprep.subr.bf16.mxu1 %v2604_v8  ;;  %v2713_v7 = vcombine.low %v137_v55, %v145_v58  ;;  %v43_v8 = vld [vmem:[%s4055_s1 + $0xa0] sm:$0xff]  ;;  %v2608_v13 = vcombine.high %v28_v5, %v36_v6  ;;  %v2607_v18 = vcombine.low %v28_v5, %v36_v6  ;;  %v140_v61 = vld [vmem:[%s4055_s1 + $0x3a8] sm:$0xff]  ;;  %v30_v6 = vld [vmem:[%s4055_s1 + $0x38] sm:$0xff] }
  0x24   :  { %v2622_v19 = vcombine.high %v43_v8, %v51_v12  ;;  %v147_v58 = vld [vmem:[%s4055_s1 + $0x3e0] sm:$0xff] }
  0x25   :  { %908 = vmatmul.mubr.bf16.vlgmr.msra.gmra.mrb[0].mxu0 %v3311_v11  ;;  %949 = vmatmul.mubr.bf16.vlgmr.msra.gmra.mrb[0].mxu1 %v3311_v11 }
  0x26   :  { %958 = vmatpush1.bf16.msra.mxu0 %v2601_v14  ;;  %999 = vmatpush1.bf16.msra.mxu1 %v2603_v15  ;;  %v44_v14 = vld [vmem:[%s4055_s1 + $0xa8] sm:$0xff] }
  0x27   :  { %959 = vmatprep.subr.bf16.mxu0 %v2618_v16  ;;  %1000 = vmatprep.subr.bf16.mxu1 %v2620_v17  ;;  %v52_v15 = vld [vmem:[%s4055_s1 + $0xe8] sm:$0xff]  ;;  %v2605_v16 = vcombine.low %v27_v63, %v35_v2  ;;  %v59_v17 = vld [vmem:[%s4055_s1 + $0x120] sm:$0xff]  ;;  %v37_v2 = vld [vmem:[%s4055_s1 + $0x70] sm:$0xff] }
  0x28   :  { %989 = vmatprep.mubr.bf16.mxu0 %v3161_v3  ;;  %1030 = vmatprep.mubr.bf16.mxu1 %v3161_v3  ;;  %v2624_v21 = vcombine.high %v44_v14, %v52_v15  ;;  %v2623_v27 = vcombine.low %v44_v14, %v52_v15  ;;  %v2638_v28 = vcombine.high %v59_v17, %v67_v20  ;;  %v46_v15 = vld [vmem:[%s4055_s1 + $0xb8] sm:$0xff] }
  0x2a   :  { %960 = vmatpush1.bf16.msra.mxu0 %v2617_v22  ;;  %1001 = vmatpush1.bf16.msra.mxu1 %v2619_v23  ;;  %v60_v22 = vld [vmem:[%s4055_s1 + $0x128] sm:$0xff] }
  0x2b   :  { %961 = vmatprep.subr.bf16.mxu0 %v2634_v24  ;;  %1002 = vmatprep.subr.bf16.mxu1 %v2636_v25  ;;  %v68_v23 = vld [vmem:[%s4055_s1 + $0x168] sm:$0xff]  ;;  %v2621_v24 = vcombine.low %v43_v8, %v51_v12  ;;  %v75_v25 = vld [vmem:[%s4055_s1 + $0x1a0] sm:$0xff]  ;;  %v53_v12 = vld [vmem:[%s4055_s1 + $0xf0] sm:$0xff] }
  0x2c   :  { %v2639_v35 = vcombine.low %v60_v22, %v68_v23  ;;  %v2654_v36 = vcombine.high %v75_v25, %v83_v26 }
  0x2e   :  { %962 = vmatpush1.bf16.msra.mxu0 %v2633_v30  ;;  %1003 = vmatpush1.bf16.msra.mxu1 %v2635_v31  ;;  %v84_v30 = vld [vmem:[%s4055_s1 + $0x1e8] sm:$0xff]  ;;  %v2640_v31 = vcombine.high %v60_v22, %v68_v23  ;;  %v62_v23 = vld [vmem:[%s4055_s1 + $0x138] sm:$0xff] }
  0x2f   :  { %963 = vmatprep.subr.bf16.mxu0 %v2650_v32  ;;  %1004 = vmatprep.subr.bf16.mxu1 %v2652_v33  ;;  %v2637_v32 = vcombine.low %v59_v17, %v67_v20  ;;  %v91_v33 = vld [vmem:[%s4055_s1 + $0x220] sm:$0xff]  ;;  %v2656_v39 = vcombine.high %v76_v29, %v84_v30  ;;  %v69_v20 = vld [vmem:[%s4055_s1 + $0x170] sm:$0xff] }
  0x30   :  { %v2670_v44 = vcombine.high %v91_v33, %v99_v34 }
  0x32   :  { %964 = vmatpush1.bf16.msra.mxu0 %v2649_v38  ;;  %1005 = vmatpush1.bf16.msra.mxu1 %v2651_v40  ;;  %v100_v38 = vld [vmem:[%s4055_s1 + $0x268] sm:$0xff]  ;;  %v2653_v40 = vcombine.low %v75_v25, %v83_v26 }
  0x33   :  { %965 = vmatprep.subr.bf16.mxu0 %v2666_v41  ;;  %1006 = vmatprep.subr.bf16.mxu1 %v2668_v43  ;;  %v107_v41 = vld [vmem:[%s4055_s1 + $0x2a0] sm:$0xff]  ;;  %v2655_v43 = vcombine.low %v76_v29, %v84_v30  ;;  %v2672_v47 = vcombine.high %v92_v37, %v100_v38 }
  0x34   :  { %v2686_v52 = vcombine.high %v107_v41, %v115_v42 }
  0x36   :  { %966 = vmatpush1.bf16.msra.mxu0 %v2665_v46  ;;  %1007 = vmatpush1.bf16.msra.mxu1 %v2667_v48  ;;  %v116_v46 = vld [vmem:[%s4055_s1 + $0x2e8] sm:$0xff]  ;;  %v2669_v48 = vcombine.low %v91_v33, %v99_v34 }
  0x37   :  { %967 = vmatprep.subr.bf16.mxu0 %v2682_v49  ;;  %1008 = vmatprep.subr.bf16.mxu1 %v2684_v51  ;;  %v123_v49 = vld [vmem:[%s4055_s1 + $0x320] sm:$0xff]  ;;  %v2671_v51 = vcombine.low %v92_v37, %v100_v38  ;;  %v2688_v55 = vcombine.high %v108_v45, %v116_v46 }
  0x38   :  { %v2702_v60 = vcombine.high %v123_v49, %v131_v50 }
  0x3a   :  { %968 = vmatpush1.bf16.msra.mxu0 %v2681_v54  ;;  %1009 = vmatpush1.bf16.msra.mxu1 %v2683_v56  ;;  %v132_v54 = vld [vmem:[%s4055_s1 + $0x368] sm:$0xff]  ;;  %v2685_v56 = vcombine.low %v107_v41, %v115_v42  ;;  %v109_v42 = vld [vmem:[%s4055_s1 + $0x2b0] sm:$0xff] }
  0x3b   :  { %969 = vmatprep.subr.bf16.mxu0 %v2698_v57  ;;  %1010 = vmatprep.subr.bf16.mxu1 %v2700_v59  ;;  %v139_v57 = vld [vmem:[%s4055_s1 + $0x3a0] sm:$0xff]  ;;  %v2687_v59 = vcombine.low %v108_v45, %v116_v46  ;;  %v2704_v63 = vcombine.high %v124_v53, %v132_v54  ;;  %v110_v46 = vld [vmem:[%s4055_s1 + $0x2b8] sm:$0xff] }
  0x3c   :  { %v2718_v5 = vcombine.high %v139_v57, %v147_v58 }
  0x3e   :  { %970 = vmatpush1.bf16.msra.mxu0 %v2697_v62  ;;  %1011 = vmatpush1.bf16.msra.mxu1 %v2699_v0  ;;  %v148_v62 = vld [vmem:[%s4055_s1 + $0x3e8] sm:$0xff]  ;;  %v2701_v0 = vcombine.low %v123_v49, %v131_v50  ;;  %v125_v50 = vld [vmem:[%s4055_s1 + $0x330] sm:$0xff] }
  0x3f   :  { %971 = vmatprep.subr.bf16.mxu0 %v2714_v1  ;;  %1012 = vmatprep.subr.bf16.mxu1 %v2716_v4  ;;  %v29_v1 = vld [vmem:[%s4055_s1 + $0x30] sm:$0xff]  ;;  %v2703_v4 = vcombine.low %v124_v53, %v132_v54  ;;  %v2720_v8 = vcombine.high %v140_v61, %v148_v62  ;;  %v126_v54 = vld [vmem:[%s4055_s1 + $0x338] sm:$0xff] }
  0x40   :  { %v2610_v14 = vcombine.high %v29_v1, %v37_v2 }
  0x42   :  { %972 = vmatpush1.bf16.msra.mxu0 %v2713_v7  ;;  %1013 = vmatpush1.bf16.msra.mxu1 %v2715_v9  ;;  %v38_v7 = vld [vmem:[%s4055_s1 + $0x78] sm:$0xff]  ;;  %v2717_v9 = vcombine.low %v139_v57, %v147_v58 }
  0x43   :  { %1039 = vmatprep.subr.bf16.mxu0 %v2606_v10  ;;  %1080 = vmatprep.subr.bf16.mxu1 %v2608_v13  ;;  %v45_v10 = vld [vmem:[%s4055_s1 + $0xb0] sm:$0xff]  ;;  %v2719_v13 = vcombine.low %v140_v61, %v148_v62  ;;  %v2612_v17 = vcombine.high %v30_v6, %v38_v7 }
  0x44   :  { %v2626_v22 = vcombine.high %v45_v10, %v53_v12  ;;  %v2625_v26 = vcombine.low %v45_v10, %v53_v12  ;;  %v141_v61 = vld [vmem:[%s4055_s1 + $0x3b0] sm:$0xff]  ;;  %v3033_v10 = vld [vmem:[%s4057_s3] sm:$0xff]  }
  0x45   :  { %990 = vmatmul.mubr.bf16.vlgmr.msra.gmra.mrb[4].mxu0 %v3311_v11  ;;  %1031 = vmatmul.mubr.bf16.vlgmr.msra.gmra.mrb[4].mxu1 %v3311_v11  ;;  %v149_v62 = vld [vmem:[%s4055_s1 + $0x3f0] sm:$0xff]  ;;  %v3034_v12 = vld [vmem:[%s4057_s3 + $0x80] sm:$0xff]  }
  0x46   :  { %1040 = vmatpush1.bf16.msra.mxu0 %v2605_v16  ;;  %1081 = vmatpush1.bf16.msra.mxu1 %v2607_v18  ;;  %v54_v16 = vld [vmem:[%s4055_s1 + $0xf8] sm:$0xff]  ;;  %v2609_v18 = vcombine.low %v29_v1, %v37_v2 }
  0x47   :  { %1041 = vmatprep.subr.bf16.mxu0 %v2622_v19  ;;  %1082 = vmatprep.subr.bf16.mxu1 %v2624_v21  ;;  %v61_v19 = vld [vmem:[%s4055_s1 + $0x130] sm:$0xff]  ;;  %v2611_v21 = vcombine.low %v30_v6, %v38_v7  ;;  %v2628_v25 = vcombine.high %v46_v15, %v54_v16  ;;  %v2627_v29 = vcombine.low %v46_v15, %v54_v16  ;;  %v3031_v6 = vld [vmem:[%s4057_s3 + $0x40] sm:$0xff]   ;;  %v3037_v15 = vld [vmem:[%s4057_s3 + $0x8] sm:$0xff]  }
  0x48   :  { %1071 = vmatprep.mubr.bf16.mxu0 %v3161_v3  ;;  %1112 = vmatprep.mubr.bf16.mxu1 %v3161_v3  ;;  %v2642_v30 = vcombine.high %v61_v19, %v69_v20  ;;  %v2641_v34 = vcombine.low %v61_v19, %v69_v20  ;;  %v2721_v7 = vcombine.low %v141_v61, %v149_v62  ;;  %v3038_v16 = vld [vmem:[%s4057_s3 + $0x88] sm:$0xff]   ;;  %v3042_v19 = vld [vmem:[%s4057_s3 + $0x90] sm:$0xff]   ;;  %v3043_v20 = vld [vmem:[%s4057_s3 + $0x58] sm:$0xff]  }
  0x4a   :  { %1042 = vmatpush1.bf16.msra.mxu0 %v2621_v24  ;;  %1083 = vmatpush1.bf16.msra.mxu1 %v2623_v27  ;;  %v70_v24 = vld [vmem:[%s4055_s1 + $0x178] sm:$0xff]  ;;  %v77_v27 = vld [vmem:[%s4055_s1 + $0x1b0] sm:$0xff] }
  0x4b   :  { %1043 = vmatprep.subr.bf16.mxu0 %v2638_v28  ;;  %1084 = vmatprep.subr.bf16.mxu1 %v2640_v31  ;;  %v85_v28 = vld [vmem:[%s4055_s1 + $0x1f0] sm:$0xff]  ;;  %v78_v31 = vld [vmem:[%s4055_s1 + $0x1b8] sm:$0xff]  ;;  %v2644_v33 = vcombine.high %v62_v23, %v70_v24  ;;  %v2643_v37 = vcombine.low %v62_v23, %v70_v24  ;;  %v3047_v24 = vld [vmem:[%s4057_s3 + $0x60] sm:$0xff]  }
  0x4c   :  { %v2658_v38 = vcombine.high %v77_v27, %v85_v28  ;;  %v2657_v41 = vcombine.low %v77_v27, %v85_v28  ;;  %v3046_v23 = vld [vmem:[%s4057_s3 + $0x98] sm:$0xff]   ;;  %v3050_v27 = vld [vmem:[%s4057_s3 + $0xa0] sm:$0xff]   ;;  %v3051_v28 = vld [vmem:[%s4057_s3 + $0x68] sm:$0xff]  }
  0x4e   :  { %1044 = vmatpush1.bf16.msra.mxu0 %v2637_v32  ;;  %1085 = vmatpush1.bf16.msra.mxu1 %v2639_v35  ;;  %v86_v32 = vld [vmem:[%s4055_s1 + $0x1f8] sm:$0xff]  ;;  %v93_v35 = vld [vmem:[%s4055_s1 + $0x230] sm:$0xff] }
  0x4f   :  { %1045 = vmatprep.subr.bf16.mxu0 %v2654_v36  ;;  %1086 = vmatprep.subr.bf16.mxu1 %v2656_v39  ;;  %v101_v36 = vld [vmem:[%s4055_s1 + $0x270] sm:$0xff]  ;;  %v94_v39 = vld [vmem:[%s4055_s1 + $0x238] sm:$0xff] }
  0x50   :  { %v2674_v45 = vcombine.high %v93_v35, %v101_v36  ;;  %v2673_v49 = vcombine.low %v93_v35, %v101_v36  ;;  %v3058_v35 = vld [vmem:[%s4057_s3 + $0xb0] sm:$0xff]   ;;  %v3059_v36 = vld [vmem:[%s4057_s3 + $0x78] sm:$0xff]  }
  0x52   :  { %1046 = vmatpush1.bf16.msra.mxu0 %v2653_v40  ;;  %1087 = vmatpush1.bf16.msra.mxu1 %v2655_v43  ;;  %v2660_v40 = vcombine.high %v78_v31, %v86_v32  ;;  %v117_v43 = vld [vmem:[%s4055_s1 + $0x2f0] sm:$0xff] }
  0x53   :  { %1047 = vmatprep.subr.bf16.mxu0 %v2670_v44  ;;  %1088 = vmatprep.subr.bf16.mxu1 %v2672_v47  ;;  %v2659_v44 = vcombine.low %v78_v31, %v86_v32  ;;  %v118_v47 = vld [vmem:[%s4055_s1 + $0x2f8] sm:$0xff]  ;;  %v2690_v53 = vcombine.high %v109_v42, %v117_v43  ;;  %v2689_v57 = vcombine.low %v109_v42, %v117_v43  ;;  %v3054_v31 = vld [vmem:[%s4057_s3 + $0xa8] sm:$0xff]   ;;  %v3055_v32 = vld [vmem:[%s4057_s3 + $0x70] sm:$0xff]  }
  0x54   :  { %v2691_v58 = vcombine.low %v110_v46, %v118_v47 }
  0x56   :  { %1048 = vmatpush1.bf16.msra.mxu0 %v2669_v48  ;;  %1089 = vmatpush1.bf16.msra.mxu1 %v2671_v51  ;;  %v133_v51 = vld [vmem:[%s4055_s1 + $0x370] sm:$0xff] }
  0x57   :  { %1049 = vmatprep.subr.bf16.mxu0 %v2686_v52  ;;  %1090 = vmatprep.subr.bf16.mxu1 %v2688_v55  ;;  %v134_v55 = vld [vmem:[%s4055_s1 + $0x378] sm:$0xff]  ;;  %v2705_v1 = vcombine.low %v125_v50, %v133_v51 }
  0x58   :  { %v2707_v2 = vcombine.low %v126_v54, %v134_v55 }
  0x5a   :  { %1050 = vmatpush1.bf16.msra.mxu0 %v2685_v56  ;;  %1091 = vmatpush1.bf16.msra.mxu1 %v2687_v59  ;;  %v2692_v56 = vcombine.high %v110_v46, %v118_v47  ;;  %v2706_v59 = vcombine.high %v125_v50, %v133_v51  ;;  %v152_v46 = vld [vmem:[%s4058_s2 + $0x8] sm:$0xff] }
  0x5b   :  { %1051 = vmatprep.subr.bf16.mxu0 %v2702_v60  ;;  %1092 = vmatprep.subr.bf16.mxu1 %v2704_v63  ;;  %v2708_v60 = vcombine.high %v126_v54, %v134_v55  ;;  %v142_v63 = vld [vmem:[%s4055_s1 + $0x3b8] sm:$0xff] }
  0x5e   :  { %1052 = vmatpush1.bf16.msra.mxu0 %v2701_v0  ;;  %1093 = vmatpush1.bf16.msra.mxu1 %v2703_v4  ;;  %v150_v0 = vld [vmem:[%s4055_s1 + $0x3f8] sm:$0xff]  ;;  %v2722_v4 = vcombine.high %v141_v61, %v149_v62 }
  0x5f   :  { %1053 = vmatprep.subr.bf16.mxu0 %v2718_v5  ;;  %1094 = vmatprep.subr.bf16.mxu1 %v2720_v8  ;;  %v2724_v5 = vcombine.high %v142_v63, %v150_v0  ;;  %v2723_v8 = vcombine.low %v142_v63, %v150_v0 }
  0x62   :  { %1054 = vmatpush1.bf16.msra.mxu0 %v2717_v9  ;;  %1095 = vmatpush1.bf16.msra.mxu1 %v2719_v13  ;;  %v3032_v9 = vld [vmem:[%s4057_s3 + $0xc0] sm:$0xff]   ;;  %v3035_v13 = vld [vmem:[%s4057_s3 + $0x48] sm:$0xff]  }
  0x63   :  { %1121 = vmatprep.subr.bf16.mxu0 %v2610_v14  ;;  %1162 = vmatprep.subr.bf16.mxu1 %v2612_v17  ;;  %v3036_v14 = vld [vmem:[%s4057_s3 + $0xc8] sm:$0xff]   ;;  %v3039_v17 = vld [vmem:[%s4057_s3 + $0x50] sm:$0xff]  }
  0x65   :  { %1072 = vmatmul.mubr.bf16.vlgmr.msra.gmra.mrb[8].mxu0 %v3311_v11  ;;  %1113 = vmatmul.mubr.bf16.vlgmr.msra.gmra.mrb[8].mxu1 %v3311_v11 }
  0x66   :  { %1122 = vmatpush1.bf16.msra.mxu0 %v2609_v18  ;;  %1163 = vmatpush1.bf16.msra.mxu1 %v2611_v21  ;;  %v3040_v18 = vld [vmem:[%s4057_s3 + $0xd0] sm:$0xff]   ;;  %v3044_v21 = vld [vmem:[%s4057_s3 + $0xd8] sm:$0xff]  }
  0x67   :  { %1123 = vmatprep.subr.bf16.mxu0 %v2626_v22  ;;  %1164 = vmatprep.subr.bf16.mxu1 %v2628_v25  ;;  %v3045_v22 = vld [vmem:[%s4057_s3 + $0x18] sm:$0xff]   ;;  %v3048_v25 = vld [vmem:[%s4057_s3 + $0xe0] sm:$0xff]  }
  0x68   :  { %1153 = vmatprep.mubr.bf16.mxu0 %v3161_v3  ;;  %1194 = vmatprep.mubr.bf16.mxu1 %v3161_v3  ;;  %v102_v3 = vld [vmem:[%s4055_s1 + $0x278] sm:$0xff] }
  0x69   :  { %v2676_v48 = vcombine.high %v94_v39, %v102_v3  ;;  %v2675_v52 = vcombine.low %v94_v39, %v102_v3  ;;  %v3062_v39 = vld [vmem:[%s4057_s3 + $0xb8] sm:$0xff]   ;;  %v3063_v3 = vld [vmem:[%s4057_s3 + $0x140] sm:$0xff]  }
  0x6a   :  { %1124 = vmatpush1.bf16.msra.mxu0 %v2625_v26  ;;  %1165 = vmatpush1.bf16.msra.mxu1 %v2627_v29  ;;  %v3049_v26 = vld [vmem:[%s4057_s3 + $0x20] sm:$0xff]   ;;  %v3052_v29 = vld [vmem:[%s4057_s3 + $0xe8] sm:$0xff]  }
  0x6b   :  { %1125 = vmatprep.subr.bf16.mxu0 %v2642_v30  ;;  %1166 = vmatprep.subr.bf16.mxu1 %v2644_v33  ;;  %v3053_v30 = vld [vmem:[%s4057_s3 + $0x28] sm:$0xff]   ;;  %v3056_v33 = vld [vmem:[%s4057_s3 + $0xf0] sm:$0xff]  }
  0x6e   :  { %1126 = vmatpush1.bf16.msra.mxu0 %v2641_v34  ;;  %1167 = vmatpush1.bf16.msra.mxu1 %v2643_v37  ;;  %v3057_v34 = vld [vmem:[%s4057_s3 + $0x30] sm:$0xff]   ;;  %v3060_v37 = vld [vmem:[%s4057_s3 + $0xf8] sm:$0xff]  }
  0x6f   :  { %1127 = vmatprep.subr.bf16.mxu0 %v2658_v38  ;;  %1168 = vmatprep.subr.bf16.mxu1 %v2660_v40  ;;  %v3061_v38 = vld [vmem:[%s4057_s3 + $0x38] sm:$0xff]   ;;  %v3064_v40 = vld [vmem:[%s4057_s3 + $0x1c0] sm:$0xff]  }
  0x72   :  { %1128 = vmatpush1.bf16.msra.mxu0 %v2657_v41  ;;  %1169 = vmatpush1.bf16.msra.mxu1 %v2659_v44  ;;  %v155_v41 = vlaneseq }
  0x73   :  { %1129 = vmatprep.subr.bf16.mxu0 %v2674_v45  ;;  %1170 = vmatprep.subr.bf16.mxu1 %v2676_v48 }
  0x74   :  { %v3700_v42 = vshrl.u32 %v155_v41, 7 }
  0x76   :  { %1130 = vmatpush1.bf16.msra.mxu0 %v2673_v49  ;;  %1171 = vmatpush1.bf16.msra.mxu1 %v2675_v52  ;;  %v157_v43 = vsub.s32 0, %v3700_v42  ;;  %v161_v44 = vsub.s32 1, %v3700_v42  ;;  %v169_v45 = vsub.s32 3, %v3700_v42  ;;  %v165_v47 = vsub.s32 2, %v3700_v42 }
  0x77   :  { %1131 = vmatprep.subr.bf16.mxu0 %v2690_v53  ;;  %1172 = vmatprep.subr.bf16.mxu1 %v2692_v56  ;;  %v173_v52 = vsub.s32 4, %v3700_v42  ;;  %v177_v53 = vsub.s32 5, %v3700_v42  ;;  %v185_v54 = vsub.s32 7, %v3700_v42  ;;  %v181_v56 = vsub.s32 6, %v3700_v42 }
  0x78   :  { %v3709_v48 = vrot.slane %v152_v46, %v157_v43  ;;  %v3711_v49 = vrot.slane %v152_v46, %v161_v44  ;;  %v3713_v50 = vrot.slane %v152_v46, %v169_v45  ;;  %v3715_v51 = vrot.slane %v152_v46, %v165_v47 }
  0x79   :  { %v3722_v55 = vrot.slane %v152_v46, %v173_v52 }
  0x7a   :  { %1132 = vmatpush1.bf16.msra.mxu0 %v2689_v57  ;;  %1173 = vmatpush1.bf16.msra.mxu1 %v2691_v58  ;;  %v3727_v57 = vrot.slane %v152_v46, %v177_v53  ;;  %v3731_v58 = vrot.slane %v152_v46, %v185_v54 }
  0x7b   :  { %1133 = vmatprep.subr.bf16.mxu0 %v2706_v59  ;;  %1174 = vmatprep.subr.bf16.mxu1 %v2708_v60  ;;  %v3735_v59 = vrot.slane %v152_v46, %v181_v56  ;;  %v3740_v60 = vld [vmem:[%s4058_s2] sm:$0xff]  ;;  %v3088_v46 = vld [vmem:[%s4057_s3 + $0x1f0] sm:$0xff]  }
  0x7c   :  { %v158_v61 = vrot.slane %v3740_v60, %v157_v43  ;;  %v166_v62 = vrot.slane %v3740_v60, %v165_v47  ;;  %v162_v63 = vrot.slane %v3740_v60, %v161_v44  ;;  %v170_v0 = vrot.slane %v3740_v60, %v169_v45  ;;  %v3085_v43 = vld [vmem:[%s4057_s3 + $0x128] sm:$0xff]   ;;  %v3087_v45 = vld [vmem:[%s4057_s3 + $0x170] sm:$0xff]  }
  0x7d   :  { %v3086_v44 = vld [vmem:[%s4057_s3 + $0x1a8] sm:$0xff]   ;;  %v174_v47 = vrot.slane %v3740_v60, %v173_v52  ;;  %v3090_v52 = vld [vmem:[%s4057_s3 + $0x1b0] sm:$0xff]  }
  0x7e   :  { %1134 = vmatpush1.bf16.msra.mxu0 %v2705_v1  ;;  %1175 = vmatpush1.bf16.msra.mxu1 %v2707_v2 }
  0x7f   :  { %1135 = vmatprep.subr.bf16.mxu0 %v2722_v4  ;;  %1176 = vmatprep.subr.bf16.mxu1 %v2724_v5 }
  0x82   :  { %1136 = vmatpush1.bf16.msra.mxu0 %v2721_v7  ;;  %1177 = vmatpush1.bf16.msra.mxu1 %v2723_v8 }
  0x83   :  { %2854 = vmatprep.subr.bf16.mxu0 %v3031_v6  ;;  %2876 = vmatprep.subr.bf16.mxu1 %v3032_v9 }
  0x85   :  { %1154 = vmatmul.mubr.bf16.vlgmr.msra.gmra.mrb[12].mxu0 %v3311_v11  ;;  %1195 = vmatmul.mubr.bf16.vlgmr.msra.gmra.mrb[12].mxu1 %v3311_v11  ;;  %v3041_v11 = vld [vmem:[%s4057_s3 + $0x10] sm:$0xff]  }
  0x86   :  { %2855 = vmatpush3.bf16.msra.mxu0 %v3033_v10  ;;  %2877 = vmatpush3.bf16.msra.mxu1 %v3034_v12 }
  0x87   :  { %2856 = vmatprep.subr.bf16.mxu0 %v3035_v13  ;;  %2878 = vmatprep.subr.bf16.mxu1 %v3036_v14 }
  0x8a   :  { %2857 = vmatpush3.bf16.msra.mxu0 %v3037_v15  ;;  %2879 = vmatpush3.bf16.msra.mxu1 %v3038_v16 }
  0x8b   :  { %2858 = vmatprep.subr.bf16.mxu0 %v3039_v17  ;;  %2880 = vmatprep.subr.bf16.mxu1 %v3040_v18 }
  0x8e   :  { %2859 = vmatpush3.bf16.msra.mxu0 %v3041_v11  ;;  %2881 = vmatpush3.bf16.msra.mxu1 %v3042_v19 }
  0x8f   :  { %2860 = vmatprep.subr.bf16.mxu0 %v3043_v20  ;;  %2882 = vmatprep.subr.bf16.mxu1 %v3044_v21  ;;  %v3065_v21 = vld [vmem:[%s4057_s3 + $0x100] sm:$0xff]  }
  0x92   :  { %2861 = vmatpush3.bf16.msra.mxu0 %v3045_v22  ;;  %2883 = vmatpush3.bf16.msra.mxu1 %v3046_v23  ;;  %v3066_v23 = vld [vmem:[%s4057_s3 + $0x180] sm:$0xff]  }
  0x93   :  { %2862 = vmatprep.subr.bf16.mxu0 %v3047_v24  ;;  %2884 = vmatprep.subr.bf16.mxu1 %v3048_v25  ;;  %v3067_v24 = vld [vmem:[%s4057_s3 + $0x148] sm:$0xff]  }
  0x94   :  { %v3068_v25 = vld [vmem:[%s4057_s3 + $0x1c8] sm:$0xff]  }
  0x96   :  { %2863 = vmatpush3.bf16.msra.mxu0 %v3049_v26  ;;  %2885 = vmatpush3.bf16.msra.mxu1 %v3050_v27  ;;  %v3069_v26 = vld [vmem:[%s4057_s3 + $0x108] sm:$0xff]  }
  0x97   :  { %2864 = vmatprep.subr.bf16.mxu0 %v3051_v28  ;;  %2886 = vmatprep.subr.bf16.mxu1 %v3052_v29  ;;  %v3070_v27 = vld [vmem:[%s4057_s3 + $0x188] sm:$0xff]   ;;  %v3071_v28 = vld [vmem:[%s4057_s3 + $0x150] sm:$0xff]  }
  0x98   :  { %v3072_v29 = vld [vmem:[%s4057_s3 + $0x1d0] sm:$0xff]  }
  0x9a   :  { %2865 = vmatpush3.bf16.msra.mxu0 %v3053_v30  ;;  %2887 = vmatpush3.bf16.msra.mxu1 %v3054_v31  ;;  %v3073_v30 = vld [vmem:[%s4057_s3 + $0x110] sm:$0xff]  }
  0x9b   :  { %2866 = vmatprep.subr.bf16.mxu0 %v3055_v32  ;;  %2888 = vmatprep.subr.bf16.mxu1 %v3056_v33  ;;  %v3074_v31 = vld [vmem:[%s4057_s3 + $0x190] sm:$0xff]   ;;  %v3075_v32 = vld [vmem:[%s4057_s3 + $0x158] sm:$0xff]  }
  0x9c   :  { %v3076_v33 = vld [vmem:[%s4057_s3 + $0x1d8] sm:$0xff]  }
  0x9e   :  { %2867 = vmatpush3.bf16.msra.mxu0 %v3057_v34  ;;  %2889 = vmatpush3.bf16.msra.mxu1 %v3058_v35  ;;  %v3077_v34 = vld [vmem:[%s4057_s3 + $0x118] sm:$0xff]  }
  0x9f   :  { %2868 = vmatprep.subr.bf16.mxu0 %v3059_v36  ;;  %2890 = vmatprep.subr.bf16.mxu1 %v3060_v37  ;;  %v3078_v35 = vld [vmem:[%s4057_s3 + $0x198] sm:$0xff]   ;;  %v3079_v36 = vld [vmem:[%s4057_s3 + $0x160] sm:$0xff]  }
  0xa0   :  { %v3080_v37 = vld [vmem:[%s4057_s3 + $0x1e0] sm:$0xff]  }
  0xa2   :  { %2869 = vmatpush3.bf16.msra.mxu0 %v3061_v38  ;;  %2891 = vmatpush3.bf16.msra.mxu1 %v3062_v39  ;;  %v3081_v38 = vld [vmem:[%s4057_s3 + $0x120] sm:$0xff]  }
  0xa3   :  { %2898 = vmatprep.subr.bf16.mxu0 %v3063_v3  ;;  %2920 = vmatprep.subr.bf16.mxu1 %v3064_v40  ;;  %v3082_v39 = vld [vmem:[%s4057_s3 + $0x1a0] sm:$0xff]   ;;  %v3083_v3 = vld [vmem:[%s4057_s3 + $0x168] sm:$0xff]  }
  0xa4   :  { %v3084_v40 = vld [vmem:[%s4057_s3 + $0x1e8] sm:$0xff]  }
  0xf8   :  { %v909_v1 = vpop.f32.mrb[0].mxu0  ;;  %v950_v4 = vpop.f32.mrb[0].mxu1 }
  0xf9   :  { %v910_v2 = vadd.f32 %v909_v1, %v158_v61  ;;  %v911_v5 = vpop.f32.mrb[1].mxu0  ;;  %v951_v6 = vadd.f32 %v950_v4, %v166_v62  ;;  %v952_v8 = vpop.f32.mrb[1].mxu1  ;;  %v182_v61 = vrot.slane %v3740_v60, %v181_v56  ;;  %v178_v62 = vrot.slane %v3740_v60, %v177_v53  ;;  %v3091_v56 = vld [vmem:[%s4057_s3 + $0x178] sm:$0xff]  }
  0xfa   :  { %v912_v7 = vadd.f32 %v911_v5, %v162_v63  ;;  %v913_v9 = vpop.f32.mrb[2].mxu0  ;;  %v953_v12 = vadd.f32 %v952_v8, %v170_v0  ;;  %v954_v13 = vpop.f32.mrb[2].mxu1  ;;  %v3089_v63 = vld [vmem:[%s4057_s3 + $0x130] sm:$0xff]   ;;  %v186_v0 = vrot.slane %v3740_v60, %v185_v54  ;;  %v3092_v53 = vld [vmem:[%s4057_s3 + $0x1f8] sm:$0xff]  }
  0xfb   :  { %v1203_v10 = vmax.f32 %v910_v2, 0.0  ;;  %v914_v14 = vpop.f32.mrb[3].mxu0  ;;  %v1205_v15 = vmax.f32 %v951_v6, 0.0  ;;  %v955_v17 = vpop.f32.mrb[3].mxu1  ;;  %v3094_v13 = vld [vmem:[%s4057_s3 + $0x1b8] sm:$0xff]  }
  0xfc   :  { %v1204_v16 = vmax.f32 %v912_v7, 0.0  ;;  %v1206_v11 = vmax.f32 %v953_v12, 0.0  ;;  %v3093_v7 = vld [vmem:[%s4057_s3 + $0x138] sm:$0xff]   ;;  %v3095_v14 = vld [vmem:[%s4057_s3 + $0x240] sm:$0xff]  }
  0xfd   :  { %v1219_v18 = vpack.c.bf16 %v1203_v10, %v1203_v10  ;;  %v1221_v19 = vpack.c.bf16 %v1205_v15, %v1205_v15 }
  0xfe   :  { %v1220_v20 = vpack.c.bf16 %v1204_v16, %v1204_v16  ;;  %v1222_v22 = vpack.c.bf16 %v1206_v11, %v1206_v11 }
 0x100   :  { %2298 = vmatprep.mubr.bf16.mxu0 %v1220_v20  ;;  %2338 = vmatprep.mubr.bf16.mxu1 %v1222_v22  ;;  %v3097_v22 = vld [vmem:[%s4057_s3 + $0x200] sm:$0xff]  }
 0x101   :  { %2299 = vmatmul.mubr.bf16.vlgmr.msra.gmra.mrb[16].mxu0 %v1219_v18  ;;  %2339 = vmatmul.mubr.bf16.vlgmr.msra.gmra.mrb[16].mxu1 %v1221_v19  ;;  %v3096_v18 = vld [vmem:[%s4057_s3 + $0x2c0] sm:$0xff]  }
 0x102   :  { %2899 = vmatpush3.bf16.msra.mxu0 %v3065_v21  ;;  %2921 = vmatpush3.bf16.msra.mxu1 %v3066_v23 }
 0x103   :  { %2900 = vmatprep.subr.bf16.mxu0 %v3067_v24  ;;  %2922 = vmatprep.subr.bf16.mxu1 %v3068_v25  ;;  %v3098_v24 = vld [vmem:[%s4057_s3 + $0x280] sm:$0xff]   ;;  %v3099_v25 = vld [vmem:[%s4057_s3 + $0x248] sm:$0xff]  }
 0x106   :  { %2901 = vmatpush3.bf16.msra.mxu0 %v3069_v26  ;;  %2923 = vmatpush3.bf16.msra.mxu1 %v3070_v27  ;;  %v3100_v26 = vld [vmem:[%s4057_s3 + $0x2c8] sm:$0xff]  }
 0x107   :  { %2902 = vmatprep.subr.bf16.mxu0 %v3071_v28  ;;  %2924 = vmatprep.subr.bf16.mxu1 %v3072_v29  ;;  %v3101_v27 = vld [vmem:[%s4057_s3 + $0x208] sm:$0xff]   ;;  %v3103_v29 = vld [vmem:[%s4057_s3 + $0x250] sm:$0xff]  }
 0x108   :  { %v3102_v28 = vld [vmem:[%s4057_s3 + $0x288] sm:$0xff]  }
 0x10a   :  { %2903 = vmatpush3.bf16.msra.mxu0 %v3073_v30  ;;  %2925 = vmatpush3.bf16.msra.mxu1 %v3074_v31  ;;  %v3104_v30 = vld [vmem:[%s4057_s3 + $0x2d0] sm:$0xff]  }
 0x10b   :  { %2904 = vmatprep.subr.bf16.mxu0 %v3075_v32  ;;  %2926 = vmatprep.subr.bf16.mxu1 %v3076_v33  ;;  %v3105_v31 = vld [vmem:[%s4057_s3 + $0x210] sm:$0xff]   ;;  %v3107_v33 = vld [vmem:[%s4057_s3 + $0x258] sm:$0xff]  }
 0x10c   :  { %v3106_v32 = vld [vmem:[%s4057_s3 + $0x290] sm:$0xff]  }
 0x10e   :  { %2905 = vmatpush3.bf16.msra.mxu0 %v3077_v34  ;;  %2927 = vmatpush3.bf16.msra.mxu1 %v3078_v35  ;;  %v3108_v34 = vld [vmem:[%s4057_s3 + $0x2d8] sm:$0xff]  }
 0x10f   :  { %2906 = vmatprep.subr.bf16.mxu0 %v3079_v36  ;;  %2928 = vmatprep.subr.bf16.mxu1 %v3080_v37  ;;  %v3109_v35 = vld [vmem:[%s4057_s3 + $0x218] sm:$0xff]   ;;  %v3111_v37 = vld [vmem:[%s4057_s3 + $0x260] sm:$0xff]  }
 0x110   :  { %v3110_v36 = vld [vmem:[%s4057_s3 + $0x298] sm:$0xff]  }
 0x112   :  { %2907 = vmatpush3.bf16.msra.mxu0 %v3081_v38  ;;  %2929 = vmatpush3.bf16.msra.mxu1 %v3082_v39  ;;  %v3112_v38 = vld [vmem:[%s4057_s3 + $0x2e0] sm:$0xff]  }
 0x113   :  { %2908 = vmatprep.subr.bf16.mxu0 %v3083_v3  ;;  %2930 = vmatprep.subr.bf16.mxu1 %v3084_v40  ;;  %v3113_v39 = vld [vmem:[%s4057_s3 + $0x220] sm:$0xff]   ;;  %v3115_v40 = vld [vmem:[%s4057_s3 + $0x268] sm:$0xff]  }
 0x114   :  { %v3114_v3 = vld [vmem:[%s4057_s3 + $0x2a0] sm:$0xff]  }
 0x116   :  { %2909 = vmatpush3.bf16.msra.mxu0 %v3085_v43  ;;  %2931 = vmatpush3.bf16.msra.mxu1 %v3086_v44  ;;  %v3116_v43 = vld [vmem:[%s4057_s3 + $0x2e8] sm:$0xff]  }
 0x117   :  { %2910 = vmatprep.subr.bf16.mxu0 %v3087_v45  ;;  %2932 = vmatprep.subr.bf16.mxu1 %v3088_v46  ;;  %v3117_v44 = vld [vmem:[%s4057_s3 + $0x228] sm:$0xff]   ;;  %v3119_v46 = vld [vmem:[%s4057_s3 + $0x270] sm:$0xff]  }
 0x118   :  { %v991_v1 = vpop.f32.mrb[4].mxu0  ;;  %v1032_v4 = vpop.f32.mrb[4].mxu1  ;;  %v3118_v45 = vld [vmem:[%s4057_s3 + $0x2a8] sm:$0xff]  }
 0x119   :  { %v992_v2 = vadd.f32 %v991_v1, %v174_v47  ;;  %v993_v42 = vpop.f32.mrb[5].mxu0  ;;  %v1033_v5 = vadd.f32 %v1032_v4, %v182_v61  ;;  %v1034_v60 = vpop.f32.mrb[5].mxu1  ;;  %v3120_v47 = vld [vmem:[%s4057_s3 + $0x2f0] sm:$0xff]  }
 0x11a   :  { %v994_v54 = vadd.f32 %v993_v42, %v178_v62  ;;  %v995_v6 = vpop.f32.mrb[6].mxu0  ;;  %2911 = vmatpush3.bf16.msra.mxu0 %v3089_v63  ;;  %v1035_v9 = vadd.f32 %v1034_v60, %v186_v0  ;;  %v1036_v10 = vpop.f32.mrb[6].mxu1  ;;  %2933 = vmatpush3.bf16.msra.mxu1 %v3090_v52  ;;  %v3121_v61 = vld [vmem:[%s4057_s3 + $0x230] sm:$0xff]   ;;  %v3123_v63 = vld [vmem:[%s4057_s3 + $0x278] sm:$0xff]  }
 0x11b   :  { %v1207_v8 = vmax.f32 %v992_v2, 0.0  ;;  %v996_v12 = vpop.f32.mrb[7].mxu0  ;;  %2912 = vmatprep.subr.bf16.mxu0 %v3091_v56  ;;  %v1209_v15 = vmax.f32 %v1033_v5, 0.0  ;;  %v1037_v17 = vpop.f32.mrb[7].mxu1  ;;  %2934 = vmatprep.subr.bf16.mxu1 %v3092_v53  ;;  %v3122_v62 = vld [vmem:[%s4057_s3 + $0x2b0] sm:$0xff]   ;;  %v3124_v52 = vld [vmem:[%s4057_s3 + $0x2f8] sm:$0xff]  }
 0x11c   :  { %v1208_v16 = vmax.f32 %v994_v54, 0.0  ;;  %v1210_v19 = vmax.f32 %v1035_v9, 0.0  ;;  %v3125_v54 = vld [vmem:[%s4057_s3 + $0x238] sm:$0xff]  }
 0x11d   :  { %v1223_v11 = vpack.c.bf16 %v1207_v8, %v1207_v8  ;;  %v1225_v20 = vpack.c.bf16 %v1209_v15, %v1209_v15 }
 0x11e   :  { %v1224_v21 = vpack.c.bf16 %v1208_v16, %v1208_v16  ;;  %2913 = vmatpush3.bf16.msra.mxu0 %v3093_v7  ;;  %v1226_v23 = vpack.c.bf16 %v1210_v19, %v1210_v19  ;;  %2935 = vmatpush3.bf16.msra.mxu1 %v3094_v13  ;;  %v3129_v16 = vld [vmem:[%s4057_s3 + $0x300] sm:$0xff]   ;;  %v3132_v19 = vld [vmem:[%s4057_s3 + $0x3c8] sm:$0xff]  }
 0x11f   :  { %2942 = vmatprep.subr.bf16.mxu0 %v3095_v14  ;;  %2964 = vmatprep.subr.bf16.mxu1 %v3096_v18  ;;  %v3130_v18 = vld [vmem:[%s4057_s3 + $0x380] sm:$0xff]  }
 0x120   :  { %2378 = vmatprep.mubr.bf16.mxu0 %v1224_v21  ;;  %2418 = vmatprep.mubr.bf16.mxu1 %v1226_v23  ;;  %v3134_v21 = vld [vmem:[%s4057_s3 + $0x388] sm:$0xff]   ;;  %v3136_v23 = vld [vmem:[%s4057_s3 + $0x3d0] sm:$0xff]  }
 0x121   :  { %2379 = vmatmul.mubr.bf16.vlgmr.msra.gmra.mrb[20].mxu0 %v1223_v11  ;;  %2419 = vmatmul.mubr.bf16.vlgmr.msra.gmra.mrb[20].mxu1 %v1225_v20  ;;  %v3131_v11 = vld [vmem:[%s4057_s3 + $0x348] sm:$0xff]  }
 0x122   :  { %2943 = vmatpush3.bf16.msra.mxu0 %v3097_v22  ;;  %2965 = vmatpush3.bf16.msra.mxu1 %v3098_v24  ;;  %v3133_v20 = vld [vmem:[%s4057_s3 + $0x308] sm:$0xff]   ;;  %v3135_v22 = vld [vmem:[%s4057_s3 + $0x350] sm:$0xff]  }
 0x123   :  { %2944 = vmatprep.subr.bf16.mxu0 %v3099_v25  ;;  %2966 = vmatprep.subr.bf16.mxu1 %v3100_v26  ;;  %v3137_v24 = vld [vmem:[%s4057_s3 + $0x310] sm:$0xff]   ;;  %v3139_v26 = vld [vmem:[%s4057_s3 + $0x358] sm:$0xff]  }
 0x124   :  { %v3138_v25 = vld [vmem:[%s4057_s3 + $0x390] sm:$0xff]  }
 0x126   :  { %2945 = vmatpush3.bf16.msra.mxu0 %v3101_v27  ;;  %2967 = vmatpush3.bf16.msra.mxu1 %v3102_v28  ;;  %v3140_v27 = vld [vmem:[%s4057_s3 + $0x3d8] sm:$0xff]  }
 0x127   :  { %2946 = vmatprep.subr.bf16.mxu0 %v3103_v29  ;;  %2968 = vmatprep.subr.bf16.mxu1 %v3104_v30  ;;  %v3141_v28 = vld [vmem:[%s4057_s3 + $0x318] sm:$0xff]   ;;  %v3143_v30 = vld [vmem:[%s4057_s3 + $0x360] sm:$0xff]  }
 0x128   :  { %v3142_v29 = vld [vmem:[%s4057_s3 + $0x398] sm:$0xff]  }
 0x12a   :  { %2947 = vmatpush3.bf16.msra.mxu0 %v3105_v31  ;;  %2969 = vmatpush3.bf16.msra.mxu1 %v3106_v32  ;;  %v3144_v31 = vld [vmem:[%s4057_s3 + $0x3e0] sm:$0xff]  }
 0x12b   :  { %2948 = vmatprep.subr.bf16.mxu0 %v3107_v33  ;;  %2970 = vmatprep.subr.bf16.mxu1 %v3108_v34  ;;  %v3145_v32 = vld [vmem:[%s4057_s3 + $0x320] sm:$0xff]   ;;  %v3147_v34 = vld [vmem:[%s4057_s3 + $0x368] sm:$0xff]  }
 0x12c   :  { %v3146_v33 = vld [vmem:[%s4057_s3 + $0x3a0] sm:$0xff]  }
 0x12e   :  { %2949 = vmatpush3.bf16.msra.mxu0 %v3109_v35  ;;  %2971 = vmatpush3.bf16.msra.mxu1 %v3110_v36  ;;  %v3148_v35 = vld [vmem:[%s4057_s3 + $0x3e8] sm:$0xff]  }
 0x12f   :  { %2950 = vmatprep.subr.bf16.mxu0 %v3111_v37  ;;  %2972 = vmatprep.subr.bf16.mxu1 %v3112_v38  ;;  %v3149_v36 = vld [vmem:[%s4057_s3 + $0x328] sm:$0xff]   ;;  %v3151_v38 = vld [vmem:[%s4057_s3 + $0x370] sm:$0xff]  }
 0x130   :  { %v3150_v37 = vld [vmem:[%s4057_s3 + $0x3a8] sm:$0xff]  }
 0x132   :  { %2951 = vmatpush3.bf16.msra.mxu0 %v3113_v39  ;;  %2973 = vmatpush3.bf16.msra.mxu1 %v3114_v3  ;;  %v3152_v39 = vld [vmem:[%s4057_s3 + $0x3f0] sm:$0xff]  }
 0x133   :  { %2952 = vmatprep.subr.bf16.mxu0 %v3115_v40  ;;  %2974 = vmatprep.subr.bf16.mxu1 %v3116_v43  ;;  %v3153_v3 = vld [vmem:[%s4057_s3 + $0x330] sm:$0xff]   ;;  %v3155_v43 = vld [vmem:[%s4057_s3 + $0x378] sm:$0xff]  }
 0x134   :  { %v3154_v40 = vld [vmem:[%s4057_s3 + $0x3b0] sm:$0xff]  }
 0x136   :  { %2953 = vmatpush3.bf16.msra.mxu0 %v3117_v44  ;;  %2975 = vmatpush3.bf16.msra.mxu1 %v3118_v45  ;;  %v3156_v45 = vld [vmem:[%s4057_s3 + $0x3f8] sm:$0xff]  }
 0x137   :  { %2954 = vmatprep.subr.bf16.mxu0 %v3119_v46  ;;  %2976 = vmatprep.subr.bf16.mxu1 %v3120_v47 }
 0x138   :  { %v1073_v0 = vpop.f32.mrb[8].mxu0  ;;  %v1114_v1 = vpop.f32.mrb[8].mxu1 }
 0x139   :  { %v1074_v56 = vadd.f32 %v1073_v0, %v3709_v48  ;;  %v1075_v53 = vpop.f32.mrb[9].mxu0  ;;  %v1115_v2 = vadd.f32 %v1114_v1, %v3715_v51  ;;  %v1116_v42 = vpop.f32.mrb[9].mxu1  ;;  %v3126_v48 = vld [vmem:[%s4057_s3 + $0x2b8] sm:$0xff]  }
 0x13a   :  { %v1076_v4 = vadd.f32 %v1075_v53, %v3711_v49  ;;  %v1077_v5 = vpop.f32.mrb[10].mxu0  ;;  %2955 = vmatpush3.bf16.msra.mxu0 %v3121_v61  ;;  %v1117_v6 = vadd.f32 %v1116_v42, %v3713_v50  ;;  %v1118_v7 = vpop.f32.mrb[10].mxu1  ;;  %2977 = vmatpush3.bf16.msra.mxu1 %v3122_v62  ;;  %v3127_v49 = vld [vmem:[%s4057_s3 + $0x340] sm:$0xff]  }
 0x13b   :  { %v1211_v60 = vmax.f32 %v1074_v56, 0.0  ;;  %v1078_v8 = vpop.f32.mrb[11].mxu0  ;;  %2956 = vmatprep.subr.bf16.mxu0 %v3123_v63  ;;  %v1213_v51 = vmax.f32 %v1115_v2, 0.0  ;;  %v1119_v10 = vpop.f32.mrb[11].mxu1  ;;  %2978 = vmatprep.subr.bf16.mxu1 %v3124_v52  ;;  %v3128_v50 = vld [vmem:[%s4057_s3 + $0x3c0] sm:$0xff]   ;;  %v3157_v56 = vld [vmem:[%s4057_s3 + $0x338] sm:$0xff]  }
 0x13c   :  { %v1212_v9 = vmax.f32 %v1076_v4, 0.0  ;;  %v1214_v13 = vmax.f32 %v1117_v6, 0.0 }
 0x13d   :  { %v1227_v12 = vpack.c.bf16 %v1211_v60, %v1211_v60  ;;  %v1229_v14 = vpack.c.bf16 %v1213_v51, %v1213_v51 }
 0x13e   :  { %v1228_v15 = vpack.c.bf16 %v1212_v9, %v1212_v9  ;;  %2957 = vmatpush3.bf16.msra.mxu0 %v3125_v54  ;;  %v1230_v17 = vpack.c.bf16 %v1214_v13, %v1214_v13  ;;  %2979 = vmatpush3.bf16.msra.mxu1 %v3126_v48  ;;  %v2725_v48 = vld [vmem:[%s4059_s4] ss:$0 sm:$0xff] }
 0x13f   :  { %2986 = vmatprep.subr.bf16.mxu0 %v3127_v49  ;;  %3008 = vmatprep.subr.bf16.mxu1 %v3128_v50 }
 0x140   :  { %2458 = vmatprep.mubr.bf16.mxu0 %v1228_v15  ;;  %2498 = vmatprep.mubr.bf16.mxu1 %v1230_v17 }
 0x141   :  { %2459 = vmatmul.mubr.bf16.vlgmr.msra.gmra.mrb[24].mxu0 %v1227_v12  ;;  %2499 = vmatmul.mubr.bf16.vlgmr.msra.gmra.mrb[24].mxu1 %v1229_v14 }
 0x142   :  { %2987 = vmatpush3.bf16.msra.mxu0 %v3129_v16  ;;  %3009 = vmatpush3.bf16.msra.mxu1 %v3130_v18 }
 0x143   :  { %2988 = vmatprep.subr.bf16.mxu0 %v3131_v11  ;;  %3010 = vmatprep.subr.bf16.mxu1 %v3132_v19 }
 0x146   :  { %2989 = vmatpush3.bf16.msra.mxu0 %v3133_v20  ;;  %3011 = vmatpush3.bf16.msra.mxu1 %v3134_v21 }
 0x147   :  { %2990 = vmatprep.subr.bf16.mxu0 %v3135_v22  ;;  %3012 = vmatprep.subr.bf16.mxu1 %v3136_v23 }
 0x14a   :  { %2991 = vmatpush3.bf16.msra.mxu0 %v3137_v24  ;;  %3013 = vmatpush3.bf16.msra.mxu1 %v3138_v25 }
 0x14b   :  { %2992 = vmatprep.subr.bf16.mxu0 %v3139_v26  ;;  %3014 = vmatprep.subr.bf16.mxu1 %v3140_v27 }
 0x14e   :  { %2993 = vmatpush3.bf16.msra.mxu0 %v3141_v28  ;;  %3015 = vmatpush3.bf16.msra.mxu1 %v3142_v29 }
 0x14f   :  { %2994 = vmatprep.subr.bf16.mxu0 %v3143_v30  ;;  %3016 = vmatprep.subr.bf16.mxu1 %v3144_v31 }
 0x152   :  { %2995 = vmatpush3.bf16.msra.mxu0 %v3145_v32  ;;  %3017 = vmatpush3.bf16.msra.mxu1 %v3146_v33 }
 0x153   :  { %2996 = vmatprep.subr.bf16.mxu0 %v3147_v34  ;;  %3018 = vmatprep.subr.bf16.mxu1 %v3148_v35 }
 0x156   :  { %2997 = vmatpush3.bf16.msra.mxu0 %v3149_v36  ;;  %3019 = vmatpush3.bf16.msra.mxu1 %v3150_v37 }
 0x157   :  { %2998 = vmatprep.subr.bf16.mxu0 %v3151_v38  ;;  %3020 = vmatprep.subr.bf16.mxu1 %v3152_v39 }
 0x158   :  { %v1155_v44 = vpop.f32.mrb[12].mxu0  ;;  %v1196_v47 = vpop.f32.mrb[12].mxu1 }
 0x159   :  { %v1156_v46 = vadd.f32 %v1155_v44, %v3722_v55  ;;  %v1157_v61 = vpop.f32.mrb[13].mxu0  ;;  %v1197_v62 = vadd.f32 %v1196_v47, %v3735_v59  ;;  %v1198_v0 = vpop.f32.mrb[13].mxu1  ;;  %v3158_v55 = vld [vmem:[%s4057_s3 + $0x3b8] sm:$0xff]  }
 0x15a   :  { %v1158_v63 = vadd.f32 %v1157_v61, %v3727_v57  ;;  %v1159_v52 = vpop.f32.mrb[14].mxu0  ;;  %2999 = vmatpush3.bf16.msra.mxu0 %v3153_v3  ;;  %v1199_v53 = vadd.f32 %v1198_v0, %v3731_v58  ;;  %v1200_v2 = vpop.f32.mrb[14].mxu1  ;;  %3021 = vmatpush3.bf16.msra.mxu1 %v3154_v40 }
 0x15b   :  { %v1215_v1 = vmax.f32 %v1156_v46, 0.0  ;;  %v1160_v4 = vpop.f32.mrb[15].mxu0  ;;  %3000 = vmatprep.subr.bf16.mxu0 %v3155_v43  ;;  %v1217_v59 = vmax.f32 %v1197_v62, 0.0  ;;  %v1201_v42 = vpop.f32.mrb[15].mxu1  ;;  %3022 = vmatprep.subr.bf16.mxu1 %v3156_v45 }
 0x15c   :  { %v1216_v57 = vmax.f32 %v1158_v63, 0.0  ;;  %v1218_v5 = vmax.f32 %v1199_v53, 0.0 }
 0x15d   :  { %v1233_v54 = vpack.c.bf16 %v1217_v59, %v1217_v59  ;;  %v1231_v6 = vpack.c.bf16 %v1215_v1, %v1215_v1  ;;  %v2587_v1 = vand.u32 127, %v155_v41 }
 0x15e   :  { %v1232_v60 = vpack.c.bf16 %v1216_v57, %v1216_v57  ;;  %3001 = vmatpush3.bf16.msra.mxu0 %v3157_v56  ;;  %v1234_v7 = vpack.c.bf16 %v1218_v5, %v1218_v5  ;;  %3023 = vmatpush3.bf16.msra.mxu1 %v3158_v55 }
 0x15f   :  { %vm2588_vm0 = vcmp.lt.s32.totalorder %v2587_v1, 32 }
 0x160   :  { %2538 = vmatprep.mubr.bf16.mxu0 %v1232_v60  ;;  %2578 = vmatprep.mubr.bf16.mxu1 %v1234_v7 }
 0x161   :  { %2539 = vmatmul.mubr.bf16.vlgmr.msra.gmra.mrb[28].mxu0 %v1231_v6  ;;  %2579 = vmatmul.mubr.bf16.vlgmr.msra.gmra.mrb[28].mxu1 %v1233_v54 }
 0x1d4   :  { %v2870_v58 = vpop.f32.mrb[16].mxu0  ;;  %v2892_v8 = vpop.f32.mrb[16].mxu1 }
 0x1d5   :  { %v2871_v49 = vpop.f32.mrb[17].mxu0  ;;  %v2893_v9 = vpop.f32.mrb[17].mxu1 }
 0x1d6   :  { %v2872_v51 = vadd.f32 %v2871_v49, %v2870_v58  ;;  %v2873_v10 = vpop.f32.mrb[18].mxu0  ;;  %v2894_v50 = vadd.f32 %v2893_v9, %v2892_v8  ;;  %v2895_v12 = vpop.f32.mrb[18].mxu1 }
 0x1d7   :  { %v2874_v13 = vpop.f32.mrb[19].mxu0  ;;  %v2896_v15 = vpop.f32.mrb[19].mxu1 }
 0x1d8   :  { %v2301_v14 = vadd.f32 %v2872_v51, %v2725_v48 }
 0x1da   :  { %v2341_v16 = vadd.f32 %v2894_v50, %v2301_v14 }
 0x1f4   :  { %v2914_v17 = vpop.f32.mrb[20].mxu0  ;;  %v2936_v18 = vpop.f32.mrb[20].mxu1 }
 0x1f5   :  { %v2915_v11 = vpop.f32.mrb[21].mxu0  ;;  %v2937_v20 = vpop.f32.mrb[21].mxu1 }
 0x1f6   :  { %v2916_v19 = vadd.f32 %v2915_v11, %v2914_v17  ;;  %v2917_v21 = vpop.f32.mrb[22].mxu0  ;;  %v2938_v22 = vadd.f32 %v2937_v20, %v2936_v18  ;;  %v2939_v23 = vpop.f32.mrb[22].mxu1 }
 0x1f7   :  { %v2918_v24 = vpop.f32.mrb[23].mxu0  ;;  %v2940_v26 = vpop.f32.mrb[23].mxu1 }
 0x1f8   :  { %v2381_v25 = vadd.f32 %v2916_v19, %v2341_v16 }
 0x1fa   :  { %v2421_v27 = vadd.f32 %v2938_v22, %v2381_v25 }
 0x214   :  { %v2958_v28 = vpop.f32.mrb[24].mxu0  ;;  %v2980_v29 = vpop.f32.mrb[24].mxu1 }
 0x215   :  { %v2959_v30 = vpop.f32.mrb[25].mxu0  ;;  %v2981_v32 = vpop.f32.mrb[25].mxu1 }
 0x216   :  { %v2960_v31 = vadd.f32 %v2959_v30, %v2958_v28  ;;  %v2961_v33 = vpop.f32.mrb[26].mxu0  ;;  %v2982_v34 = vadd.f32 %v2981_v32, %v2980_v29  ;;  %v2983_v35 = vpop.f32.mrb[26].mxu1 }
 0x217   :  { %v2962_v36 = vpop.f32.mrb[27].mxu0  ;;  %v2984_v38 = vpop.f32.mrb[27].mxu1 }
 0x218   :  { %v2461_v37 = vadd.f32 %v2960_v31, %v2421_v27 }
 0x21a   :  { %v2501_v39 = vadd.f32 %v2982_v34, %v2461_v37 }
 0x234   :  { %v3002_v3 = vpop.f32.mrb[28].mxu0  ;;  %v3024_v40 = vpop.f32.mrb[28].mxu1 }
 0x235   :  { %v3003_v43 = vpop.f32.mrb[29].mxu0  ;;  %v3025_v45 = vpop.f32.mrb[29].mxu1 }
 0x236   :  { %v3004_v44 = vadd.f32 %v3003_v43, %v3002_v3  ;;  %v3005_v46 = vpop.f32.mrb[30].mxu0  ;;  %v3026_v47 = vadd.f32 %v3025_v45, %v3024_v40  ;;  %v3027_v61 = vpop.f32.mrb[30].mxu1 }
 0x237   :  { %v3006_v62 = vpop.f32.mrb[31].mxu0  ;;  %v3028_v0 = vpop.f32.mrb[31].mxu1 }
 0x238   :  { %v2541_v63 = vadd.f32 %v3004_v44, %v2501_v39 }
 0x23a   :  { %v2581_v52 = vadd.f32 %v3026_v47, %v2541_v63 }
 0x23c   :  { %v2589_v56 = vmul.f32 10.0, %v2581_v52 }
 0x23e   :  { %3159 = vtanh.f32 %v2589_v56 }
 0x248   :  { %v3160_v53 = vpop.eup %3159 }
 0x249   :  { %v2591_v2 = vsel %vm2588_vm0, %v2581_v52, %v3160_v53 }
 0x24a   :  { %2592 = vst [vmem:[%s4060_s5] sm:$0xff] %v2591_v2 }

</bundles_post_ra>
